<compile_context>
chip_gen: v5e
topology: v5e:2x2
jax: 0.10.0
libtpu: 0.0.40
codegen_flags: <defaults>
</compile_context>

<pallas_src>
import jax
import jax.numpy as jnp
from jax.experimental import pallas as pl
from jax.experimental.pallas import tpu as pltpu


def _keypoint_loss_kernel(packed_ref, out_ref):
    # packed_ref: (7, N, K) = [pred_x, pred_y, gt_x, gt_y, mask, area, inv_sig]
    px = packed_ref[0]            # (N, K)
    py = packed_ref[1]
    gx = packed_ref[2]
    gy = packed_ref[3]
    mask = packed_ref[4]
    area = packed_ref[5]          # area broadcast over K
    inv_sig = packed_ref[6]       # 1 / (8 * sigmas^2) broadcast over N

    n, k = mask.shape

    # squared Euclidean distance per keypoint
    dx = px - gx
    dy = py - gy
    d = dx * dx + dy * dy                                   # (N, K)

    # kpt_loss_factor = K / (count_nonzero(mask, axis=1) + 1e-9)
    # Explicit compare so non-0/1 masks (visibility flags / soft weights)
    # still match the reference; one free VPU cmp.
    cnt = jnp.sum((mask != 0).astype(jnp.float32), axis=1, keepdims=True)  # (N, 1)
    kpt_loss_factor = jnp.float32(k) / (cnt + 1e-9)         # (N, 1)

    # e = d / ((2*sig)^2 * (area + 1e-9) * 2) == d * inv_sig * inv_area
    inv_area = 1.0 / (area + 1e-9)                          # (N, K), exact
    e = d * inv_sig * inv_area                              # (N, K)

    val = kpt_loss_factor * ((1.0 - jnp.exp(-e)) * mask)    # (N, K)

    # mean over the logical (N, K) elements, as a sum * constant
    out_ref[0] = jnp.sum(val) * jnp.float32(1.0 / (n * k))


def keypoint_loss(pred_kpts, gt_kpts, kpt_mask, area, sigmas):
    """pred_kpts/gt_kpts: (N, K, >=2); kpt_mask: (N, K); area: (N, 1); sigmas: (K,)."""
    n, k = kpt_mask.shape

    # Fold the compile-time sigma term: 1 / ((2*sig)^2 * 2) == 1 / (8*sig^2).
    sigmas = sigmas.astype(jnp.float32)
    inv_sig = 1.0 / (8.0 * sigmas * sigmas)                 # (K,)

    # Single stack expression -> one XLA fusion producing the (7, N, K) packed
    # input: [pred_x, pred_y, gt_x, gt_y, mask, area, inv_sig].
    packed = jnp.stack(
        [
            pred_kpts[..., 0].astype(jnp.float32),
            pred_kpts[..., 1].astype(jnp.float32),
            gt_kpts[..., 0].astype(jnp.float32),
            gt_kpts[..., 1].astype(jnp.float32),
            kpt_mask.astype(jnp.float32),
            jnp.broadcast_to(area.astype(jnp.float32), (n, k)),
            jnp.broadcast_to(inv_sig[None, :], (n, k)),
        ],
        axis=0,
    )                                                        # (7, N, K) f32

    out = pl.pallas_call(
        _keypoint_loss_kernel,
        out_shape=jax.ShapeDtypeStruct((1,), jnp.float32),
        in_specs=[pl.BlockSpec(memory_space=pltpu.MemorySpace.VMEM)],
        out_specs=pl.BlockSpec(memory_space=pltpu.MemorySpace.SMEM),
    )(packed)
    return out[0]


def keypoint_loss_ref(pred_kpts, gt_kpts, kpt_mask, area, sigmas):
    """Pure-JAX reference matching the PyTorch forward."""
    d = (pred_kpts[..., 0] - gt_kpts[..., 0]) ** 2 + (pred_kpts[..., 1] - gt_kpts[..., 1]) ** 2
    kpt_loss_factor = kpt_mask.shape[1] / (jnp.sum(kpt_mask != 0, axis=1) + 1e-9)
    e = d / ((2 * sigmas) ** 2 * (area + 1e-9) * 2)
    return jnp.mean(kpt_loss_factor.reshape(-1, 1) * ((1 - jnp.exp(-e)) * kpt_mask))


if __name__ == "__main__":
    key = jax.random.PRNGKey(0)
    N, K = 8, 17  # 8 instances, 17 COCO keypoints

    k1, k2, k3, k4 = jax.random.split(key, 4)
    pred_kpts = jax.random.uniform(k1, (N, K, 2), jnp.float32) * 16.0
    gt_kpts = jax.random.uniform(k2, (N, K, 2), jnp.float32) * 16.0
    kpt_mask = (jax.random.uniform(k3, (N, K), jnp.float32) > 0.3).astype(jnp.float32)
    area = jax.random.uniform(k4, (N, 1), jnp.float32) * 32.0 + 1.0

    # Deterministic OKS sigmas (COCO keypoint sigmas).
    sigmas = jnp.array(
        [0.026, 0.025, 0.025, 0.035, 0.035, 0.079, 0.079, 0.072, 0.072,
         0.062, 0.062, 0.107, 0.107, 0.087, 0.087, 0.089, 0.089],
        dtype=jnp.float32,
    )

    loss = keypoint_loss(pred_kpts, gt_kpts, kpt_mask, area, sigmas)
    jax.block_until_ready(loss)

    ref = keypoint_loss_ref(pred_kpts, gt_kpts, kpt_mask, area, sigmas)
    assert jnp.allclose(loss, ref, rtol=1e-5, atol=1e-6), (loss, ref)

    print("KERNEL_OK")
</pallas_src>

<mosaic_0001>
module attributes {stable_mosaic.version = 11 : i64} {
  func.func @_keypoint_loss_kernel(%arg0: memref<7x8x17xf32, #tpu.memory_space<vmem>>, %arg1: memref<1xf32, #tpu.memory_space<smem>>) attributes {dimension_semantics = [], scalar_prefetch = 0 : i64, scratch_operands = 0 : i64, tpu.core_type = #tpu.core_type<tc>} {
    %c0 = arith.constant 0 : index
    %c0_0 = arith.constant 0 : index
    %c0_1 = arith.constant 0 : index
    %0 = vector.load %arg0[%c0, %c0_0, %c0_1] : memref<7x8x17xf32, #tpu.memory_space<vmem>>, vector<1x8x17xf32>
    %1 = vector.shape_cast %0 : vector<1x8x17xf32> to vector<8x17xf32>
    %c1 = arith.constant 1 : index
    %c0_2 = arith.constant 0 : index
    %c0_3 = arith.constant 0 : index
    %2 = vector.load %arg0[%c1, %c0_2, %c0_3] : memref<7x8x17xf32, #tpu.memory_space<vmem>>, vector<1x8x17xf32>
    %3 = vector.shape_cast %2 : vector<1x8x17xf32> to vector<8x17xf32>
    %c2 = arith.constant 2 : index
    %c0_4 = arith.constant 0 : index
    %c0_5 = arith.constant 0 : index
    %4 = vector.load %arg0[%c2, %c0_4, %c0_5] : memref<7x8x17xf32, #tpu.memory_space<vmem>>, vector<1x8x17xf32>
    %5 = vector.shape_cast %4 : vector<1x8x17xf32> to vector<8x17xf32>
    %c3 = arith.constant 3 : index
    %c0_6 = arith.constant 0 : index
    %c0_7 = arith.constant 0 : index
    %6 = vector.load %arg0[%c3, %c0_6, %c0_7] : memref<7x8x17xf32, #tpu.memory_space<vmem>>, vector<1x8x17xf32>
    %7 = vector.shape_cast %6 : vector<1x8x17xf32> to vector<8x17xf32>
    %c4 = arith.constant 4 : index
    %c0_8 = arith.constant 0 : index
    %c0_9 = arith.constant 0 : index
    %8 = vector.load %arg0[%c4, %c0_8, %c0_9] : memref<7x8x17xf32, #tpu.memory_space<vmem>>, vector<1x8x17xf32>
    %9 = vector.shape_cast %8 : vector<1x8x17xf32> to vector<8x17xf32>
    %c5 = arith.constant 5 : index
    %c0_10 = arith.constant 0 : index
    %c0_11 = arith.constant 0 : index
    %10 = vector.load %arg0[%c5, %c0_10, %c0_11] : memref<7x8x17xf32, #tpu.memory_space<vmem>>, vector<1x8x17xf32>
    %11 = vector.shape_cast %10 : vector<1x8x17xf32> to vector<8x17xf32>
    %c6 = arith.constant 6 : index
    %c0_12 = arith.constant 0 : index
    %c0_13 = arith.constant 0 : index
    %12 = vector.load %arg0[%c6, %c0_12, %c0_13] : memref<7x8x17xf32, #tpu.memory_space<vmem>>, vector<1x8x17xf32>
    %13 = vector.shape_cast %12 : vector<1x8x17xf32> to vector<8x17xf32>
    %14 = arith.subf %1, %5 : vector<8x17xf32>
    %15 = arith.subf %3, %7 : vector<8x17xf32>
    %16 = arith.mulf %14, %14 : vector<8x17xf32>
    %17 = arith.mulf %15, %15 : vector<8x17xf32>
    %18 = arith.addf %16, %17 : vector<8x17xf32>
    %cst = arith.constant 0.000000e+00 : f32
    %19 = vector.broadcast %cst : f32 to vector<8x17xf32>
    %20 = arith.cmpf one, %9, %19 : vector<8x17xf32>
    %21 = arith.extui %20 : vector<8x17xi1> to vector<8x17xi32>
    %22 = arith.sitofp %21 : vector<8x17xi32> to vector<8x17xf32>
    %cst_14 = arith.constant dense<0.000000e+00> : vector<8xf32>
    %23 = vector.multi_reduction <add>, %22, %cst_14 [1] : vector<8x17xf32> to vector<8xf32>
    %24 = vector.shape_cast %23 : vector<8xf32> to vector<8x1xf32>
    %cst_15 = arith.constant 9.99999971E-10 : f32
    %25 = vector.broadcast %cst_15 : f32 to vector<8x1xf32>
    %26 = arith.addf %24, %25 : vector<8x1xf32>
    %cst_16 = arith.constant 1.700000e+01 : f32
    %27 = vector.broadcast %cst_16 : f32 to vector<8x1xf32>
    %28 = arith.divf %27, %26 : vector<8x1xf32>
    %cst_17 = arith.constant 9.99999971E-10 : f32
    %29 = vector.broadcast %cst_17 : f32 to vector<8x17xf32>
    %30 = arith.addf %11, %29 : vector<8x17xf32>
    %cst_18 = arith.constant 1.000000e+00 : f32
    %31 = vector.broadcast %cst_18 : f32 to vector<8x17xf32>
    %32 = arith.divf %31, %30 : vector<8x17xf32>
    %33 = arith.mulf %18, %13 : vector<8x17xf32>
    %34 = arith.mulf %33, %32 : vector<8x17xf32>
    %cst_19 = arith.constant 0.000000e+00 : f32
    %35 = vector.broadcast %cst_19 : f32 to vector<8x17xf32>
    %36 = arith.subf %35, %34 : vector<8x17xf32>
    %37 = math.exp %36 : vector<8x17xf32>
    %cst_20 = arith.constant 1.000000e+00 : f32
    %38 = vector.broadcast %cst_20 : f32 to vector<8x17xf32>
    %39 = arith.subf %38, %37 : vector<8x17xf32>
    %40 = arith.mulf %39, %9 : vector<8x17xf32>
    %41 = vector.broadcast %28 : vector<8x1xf32> to vector<8x17xf32>
    %42 = arith.mulf %41, %40 : vector<8x17xf32>
    %43 = vector.shape_cast %42 : vector<8x17xf32> to vector<1x8x17xf32>
    %cst_21 = arith.constant dense<0.000000e+00> : vector<1xf32>
    %44 = vector.multi_reduction <add>, %43, %cst_21 [1, 2] : vector<1x8x17xf32> to vector<1xf32>
    %45 = vector.shape_cast %44 : vector<1xf32> to vector<1x1x1xf32>
    %46 = vector.extract %45[0, 0, 0] : f32 from vector<1x1x1xf32>
    %cst_22 = arith.constant 0.0073529412 : f32
    %47 = arith.mulf %46, %cst_22 : f32
    %c0_23 = arith.constant 0 : index
    %48 = memref.load %arg1[%c0_23] : memref<1xf32, #tpu.memory_space<smem>>
    memref.store %47, %arg1[%c0_23] : memref<1xf32, #tpu.memory_space<smem>>
    return
  }
}

</mosaic_0001>

<bundles_post_ra>
// kernel: tpu_custom_call.1
= control target key start
LH: loop header
LB: loop body
LE: loop exit
PB: predicated region body
PF: predicated region fallthrough
CT: control target
= control target key end

     0   :  { %6 = vsyncpa [#allocation3], 0  ;;  %s196_s0 = inlined_call_operand.hbm [shape: f32[7,8,17], index: 0, kind: input, shape index: {}]   ;;  %s197_s1 = inlined_call_operand.hbm [shape: f32[1], index: 1, kind: output, shape index: {}]  }
   0x1   :  { %7 = vsyncpa [#allocation4], 0  ;;  %s12_s8 = sshll.u32 %s196_s0, 4  ;;  %s173_s9 = smov [#allocation2]   ;;  %s13_s8 = int_to_ptr.hbm [resolvable:$true] %s12_s8 }
   0x2   :  { %s14_s10 = sshll.u32 %s173_s9, 4  ;;  %s174_s11 = smov 128   ;;  %s15_s10 = int_to_ptr.vmem [resolvable:$true] %s14_s10 }
   0x3   :  { %s175_s12 = smov 8  }
   0x4   :  { %20 = dma.hbm_to_vmem [thread:$0]  %s13_s8, 896, %s15_s10, [#allocation3], %s174_s11, %s174_s11, %s175_s12  }
   0x5   :  { %169 = dma.done.wait [#allocation3], 896  }
   0x6   :  { %170 = vsyncadd [#allocation3], 4294966400  ;;  %v33_v0 = vld [vmem:[#allocation2 + $0x20] sm:$0xff]  ;;  %vm46_vm0 = vcmask 138240   ;;  %v176_v1 = vmov 0.0   ;;  %v35_v4 = vld [vmem:[#allocation2 + $0x28] sm:$0xff] }
   0x7   :  { %vm43_vm1 = vcmp.ne.f32.partialorder %v33_v0, 0.0  ;;  %v66_v5 = vadd.f32 1e-09, %v35_v4  ;;  %v25_v8 = vld [vmem:[#allocation2] sm:$0xff]  ;;  %v27_v9 = vld [vmem:[#allocation2 + $0x8] sm:$0xff]  ;;  %v29_v10 = vld [vmem:[#allocation2 + $0x10] sm:$0xff] }
   0x8   :  { %v119_v2 = vsel %vm43_vm1, 1.0, %v176_v1  ;;  %v31_v11 = vld [vmem:[#allocation2 + $0x18] sm:$0xff]  ;;  %v38_v13 = vsub.f32 %v25_v8, %v29_v10  ;;  %v37_v22 = vld [vmem:[#allocation2 + $0x30] sm:$0xff]  ;;  %s108_s14 = sshll.u32 %s197_s1, 4  ;;  %s177_s17 = smov [#allocation5]   ;;  %s109_s14 = int_to_ptr.hbm [resolvable:$true] %s108_s14 }
   0x9   :  { %v47_v3 = vsel %vm46_vm0, %v119_v2, 0.0  ;;  %127 = vrcp.f32 %v66_v5  ;;  %v39_v14 = vsub.f32 %v27_v9, %v31_v11  ;;  %vm72_vm2 = vweird.f32 %v66_v5 }
   0xa   :  { %48 = vadd.xlane.f32.xlu0 %v47_v3  ;;  %v40_v16 = vmul.f32 %v38_v13, %v38_v13  ;;  %v78_v18 = vand.u32 2147483648, %v66_v5  ;;  %v76_v20 = vand.u32 2147483647, %v66_v5 }
   0xb   :  { %v41_v17 = vmul.f32 %v39_v14, %v39_v14 }
   0xc   :  { %v79_v23 = vor.u32 1.1754944e-38, %v78_v18  ;;  %vm77_vm5 = vcmp.eq.f32.partialorder %v76_v20, 8.507059e+37 }
   0xd   :  { %v42_v21 = vadd.f32 %v41_v17, %v40_v16 }
   0xf   :  { %v128_v6 = vpop.eup %127  ;;  %v82_v25 = vmul.f32 %v42_v21, %v37_v22 }
  0x10   :  { %v68_v7 = vmul.f32 %v128_v6, %v66_v5  ;;  %vm73_vm3 = vweird.f32 %v128_v6 }
  0x11   :  { %vm74_vm4 = vmor %vm72_vm2, %vm73_vm3 }
  0x12   :  { %v69_v12 = vsub.f32 1.0, %v68_v7 }
  0x14   :  { %v70_v15 = vmul.f32 %v128_v6, %v69_v12 }
  0x16   :  { %v71_v19 = vadd.f32 %v128_v6, %v70_v15 }
  0x18   :  { %v75_v24 = vsel %vm74_vm4, %v128_v6, %v71_v19 }
  0x19   :  { %v80_v26 = vsel %vm77_vm5, %v79_v23, %v75_v24 }
  0x1a   :  { %v83_v27 = vmul.f32 %v82_v25, %v80_v26 }
  0x1c   :  { %v84_v28 = vsub.f32 0.0, %v83_v27 }
  0x1e   :  { %v85_v30 = vmul.f32 1.442695, %v84_v28 }
  0x7d   :  { %v49_v29 = vpop.xlane.xlu0 %48 }
  0x7e   :  { %v50_v31 = vadd.f32 1e-09, %v49_v29 }
  0x80   :  { %129 = vrcp.f32 %v50_v31  ;;  %v62_v36 = vand.u32 2147483648, %v50_v31  ;;  %v60_v39 = vand.u32 2147483647, %v50_v31  ;;  %vm56_vm7 = vweird.f32 %v50_v31 }
  0x81   :  { %131 = vpow2.f32 %v85_v30 }
  0x82   :  { %v63_v41 = vor.u32 1.1754944e-38, %v62_v36  ;;  %vm61_vm9 = vcmp.eq.f32.partialorder %v60_v39, 8.507059e+37 }
  0x86   :  { %v130_v32 = vpop.eup %129 }
  0x87   :  { %v52_v33 = vmul.f32 %v130_v32, %v50_v31  ;;  %v132_v34 = vpop.eup %131  ;;  %vm57_vm6 = vweird.f32 %v130_v32 }
  0x88   :  { %v87_v37 = vsub.f32 1.0, %v132_v34  ;;  %vm58_vm8 = vmor %vm56_vm7, %vm57_vm6 }
  0x89   :  { %v53_v35 = vsub.f32 1.0, %v52_v33 }
  0x8a   :  { %v88_v42 = vmul.f32 %v87_v37, %v33_v0 }
  0x8b   :  { %v54_v38 = vmul.f32 %v130_v32, %v53_v35 }
  0x8d   :  { %v55_v40 = vadd.f32 %v130_v32, %v54_v38 }
  0x8f   :  { %v59_v43 = vsel %vm58_vm8, %v130_v32, %v55_v40 }
  0x90   :  { %v64_v44 = vsel %vm61_vm9, %v63_v41, %v59_v43 }
  0x91   :  { %v65_v45 = vmul.f32 17.0, %v64_v44 }
  0x93   :  { %v89_v46 = vmul.f32 %v88_v42, %v65_v45 }
  0x95   :  { %v90_v47 = vsel %vm46_vm0, %v89_v46, 0.0 }
  0x96   :  { %91 = vadd.xlane.f32.xlu0 %v90_v47 }
 0x109   :  { %v92_v48 = vpop.xlane.xlu0 %91 }
 0x10a   :  { %v93_v49 = vrot.slane %v92_v48, 4 }
 0x10c   :  { %v94_v50 = vadd.f32 %v93_v49, %v92_v48 }
 0x10e   :  { %v95_v51 = vrot.slane %v94_v50, 2 }
 0x110   :  { %v96_v52 = vadd.f32 %v95_v51, %v94_v50 }
 0x112   :  { %v97_v53 = vrot.slane %v96_v52, 1 }
 0x114   :  { %v98_v54 = vadd.f32 %v97_v53, %v96_v52 }
 0x116   :  { %120 = vpush %v98_v54 }
 0x147   :  { %s121_s15 = spop %120 }
 0x148   :  { %s100_s16 = smul.f32 0.007352941, %s121_s15 }
 0x14a   :  { %102 = sst [smem:[#allocation5]] %s100_s16 }
 0x14b   :  { %111 = dma.smem_to_hbm %s177_s17, 16, %s109_s14, [#allocation4]  }
 0x14c   :  { %171 = dma.done.wait [#allocation4], 16  }
 0x14d   :  { %172 = vsyncadd [#allocation4], 4294967280 }
 0x14e   :  { %116 = sfence }
 0x14f   :  { %117 = vsyncpa [#allocation3], 1 }
 0x150   :  { %118 = vsyncpa [#allocation4], 1 }

</bundles_post_ra>
